<compile_context>
chip_gen: v5e
topology: v5e:2x2
jax: 0.10.0
libtpu: 0.0.40
codegen_flags: <defaults>
</compile_context>

<pallas_src>
import math

import jax
import jax.numpy as jnp
from jax import lax
from jax.experimental import pallas as pl
from jax.experimental.pallas import tpu as pltpu


_MASK_FILL = -9000000000000000.0
_VMEM_LIMIT = 32 * 1024 * 1024  # explicit scoped-VMEM cap with headroom on v5e/v6e/v7x


# ---------------------------------------------------------------------------
# Tiled linear projection kernel:  out = x @ w + b
# ---------------------------------------------------------------------------

def _linear_kernel(x_ref, w_ref, b_ref, o_ref):
    # bf16 MXU operands, f32 accumulation, f32 bias add.
    x = x_ref[...].astype(jnp.bfloat16)
    acc = jnp.dot(x, w_ref[...], preferred_element_type=jnp.float32)
    o_ref[...] = (acc + b_ref[...]).astype(o_ref.dtype)


def pallas_linear(x2d, w_t_bf16, bias_f32, out_dtype):
    """x2d: (M, K); w_t_bf16: (K, N) bf16; bias_f32: (N,) -> (M, N) out_dtype."""
    M, K = x2d.shape
    N = w_t_bf16.shape[1]
    tm = M if M <= 256 else 256          # row tile; weight/bias stay VMEM-resident
    return pl.pallas_call(
        _linear_kernel,
        grid=(pl.cdiv(M, tm),),
        in_specs=[
            pl.BlockSpec((tm, K), lambda i: (i, 0)),
            pl.BlockSpec((K, N), lambda i: (0, 0)),     # constant -> fetched once
            pl.BlockSpec((1, N), lambda i: (0, 0)),
        ],
        out_specs=pl.BlockSpec((tm, N), lambda i: (i, 0)),
        out_shape=jax.ShapeDtypeStruct((M, N), out_dtype),
        compiler_params=pltpu.CompilerParams(
            dimension_semantics=("parallel",),
            vmem_limit_bytes=_VMEM_LIMIT),
    )(x2d, w_t_bf16, bias_f32.reshape(1, N))


# ---------------------------------------------------------------------------
# Fused multi-head attention kernel (one grid step per batch element)
# ---------------------------------------------------------------------------

def _make_attn_kernel(*, H, d, R, has_mask, want_attn, scale):
    has_rel = R > 0
    nbuck = 2 * R + 1

    def kernel(*refs):
        i = 0
        qkv_ref = refs[i]; i += 1                       # (S, 3*H*d)   bf16
        if has_rel:
            table_ref = refs[i]; i += 1                 # (2R+1, d)    bf16
            bucket_ref = refs[i]; i += 1                # (S, S)       int32
        if has_mask:
            mask_ref = refs[i]; i += 1                  # (S, S)       int8
        out_ref = refs[i]; i += 1                       # (S, H*d)
        attn_ref = refs[i] if want_attn else None       # (H, S, S)

        qkv = qkv_ref[...]
        if has_mask:
            invalid = mask_ref[...] == 0
        if has_rel:
            table = table_ref[...]
            bucket = bucket_ref[...]

        vals_per_head = []
        for h in range(H):
            base = 3 * d * h
            q = qkv[:, base:base + d]
            k = qkv[:, base + d:base + 2 * d]
            v = qkv[:, base + 2 * d:base + 3 * d]

            # Fold 1/sqrt(d) into q once (covers both q@k^T and the rel-bias term).
            qs = (q.astype(jnp.float32) * scale).astype(jnp.bfloat16)

            # q @ k^T on the MXU (contract the last dim of both; no transpose copy).
            logits = lax.dot_general(
                qs, k, (((1,), (1,)), ((), ())),
                preferred_element_type=jnp.float32)                    # (S, S)

            if has_rel:
                # bias[i, j] = (q @ table^T)[i, bucket[i, j]]
                qt = lax.dot_general(
                    qs, table, (((1,), (1,)), ((), ())),
                    preferred_element_type=jnp.float32)                # (S, 2R+1)
                for r in range(nbuck):
                    logits = logits + jnp.where(bucket == r, qt[:, r:r + 1], 0.0)

            if has_mask:
                logits = jnp.where(invalid, _MASK_FILL, logits)

            m = jnp.max(logits, axis=-1, keepdims=True)
            e = jnp.exp(logits - m)
            denom = jnp.sum(e, axis=-1, keepdims=True)
            attn = e * pl.reciprocal(denom, approx=True)               # (S, S) f32

            vals = jnp.dot(attn.astype(jnp.bfloat16), v,
                           preferred_element_type=jnp.float32)         # (S, d)

            if has_rel:
                # values1[i, :] = sum_j attn[i, j] * table[bucket[i, j], :]
                #              = (per-bucket sums of attn) @ table
                ab = jnp.concatenate(
                    [jnp.sum(jnp.where(bucket == r, attn, 0.0),
                             axis=-1, keepdims=True) for r in range(nbuck)],
                    axis=-1)                                           # (S, 2R+1)
                vals = vals + jnp.dot(ab.astype(jnp.bfloat16), table,
                                      preferred_element_type=jnp.float32)

            vals_per_head.append(vals)
            if want_attn:
                attn_ref[h, :, :] = attn.astype(attn_ref.dtype)

        # Single lane-dense (S, embed_dim) store.
        out_ref[...] = jnp.concatenate(vals_per_head, axis=-1).astype(out_ref.dtype)

    return kernel


def pallas_attention(qkv3, table_bf16, bucket_i32, mask_i8, *, H, d, R, want_attn):
    """qkv3: (B, S, 3*H*d) bf16 -> values (B, S, H*d) bf16 [, attn (B, H, S, S) f32]."""
    B, S, _ = qkv3.shape
    E = H * d
    has_rel = R > 0
    has_mask = mask_i8 is not None

    kernel = _make_attn_kernel(H=H, d=d, R=R, has_mask=has_mask,
                               want_attn=want_attn, scale=1.0 / math.sqrt(d))

    in_specs = [pl.BlockSpec((None, S, 3 * E), lambda b: (b, 0, 0))]
    args = [qkv3]
    if has_rel:
        in_specs.append(pl.BlockSpec((2 * R + 1, d), lambda b: (0, 0)))   # resident
        in_specs.append(pl.BlockSpec((S, S), lambda b: (0, 0)))           # resident
        args += [table_bf16, bucket_i32]
    if has_mask:
        in_specs.append(pl.BlockSpec((None, S, S), lambda b: (b, 0, 0)))
        args.append(mask_i8)

    out_specs = [pl.BlockSpec((None, S, E), lambda b: (b, 0, 0))]
    out_shape = [jax.ShapeDtypeStruct((B, S, E), jnp.bfloat16)]
    if want_attn:
        out_specs.append(pl.BlockSpec((None, H, S, S), lambda b: (b, 0, 0, 0)))
        out_shape.append(jax.ShapeDtypeStruct((B, H, S, S), jnp.float32))

    outs = pl.pallas_call(
        kernel,
        grid=(B,),
        in_specs=in_specs,
        out_specs=out_specs,
        out_shape=out_shape,
        compiler_params=pltpu.CompilerParams(
            dimension_semantics=("parallel",),      # B >= 2 splits across v7x's 2 TCs
            vmem_limit_bytes=_VMEM_LIMIT),
    )(*args)

    if want_attn:
        return outs[0], outs[1]
    return outs[0], None


# ---------------------------------------------------------------------------
# RelativePositionalEncoding index arithmetic (host-side JAX glue)
# ---------------------------------------------------------------------------

def relative_position_buckets(S, max_rel, clip_pad=True):
    rq = jnp.arange(S)
    rk = jnp.arange(S)
    dist = rk[None, :] - rq[:, None]
    dist = jnp.clip(dist, -max_rel, max_rel)
    if clip_pad:
        dist = dist.at[1:-1, 0].set(-max_rel)
        dist = dist.at[1:-1, -1].set(max_rel)
    return (dist + max_rel).astype(jnp.int32)        # (S, S), values in [0, 2R]


def relative_position_embeddings(table, S, max_rel, clip_pad=True):
    # Dense (S, S, d) form — used only by the pure-JAX reference.
    return table[relative_position_buckets(S, max_rel, clip_pad)]


# ---------------------------------------------------------------------------
# Module wrapper (deterministic xavier_uniform init, zero biases, like torch)
# ---------------------------------------------------------------------------

def xavier_uniform(key, shape):
    fan_out, fan_in = shape[0], shape[1]
    bound = math.sqrt(6.0 / (fan_in + fan_out))
    return jax.random.uniform(key, shape, jnp.float32, -bound, bound)


class MultiheadAttentionPallas:
    def __init__(self, key, input_dim, embed_dim, num_heads,
                 max_relative_position=0, clip_pad=True):
        assert embed_dim % num_heads == 0
        self.embed_dim = embed_dim
        self.num_heads = num_heads
        self.head_dim = embed_dim // num_heads
        self.max_relative_position = max_relative_position
        self.clip_pad = clip_pad

        k1, k2, k3, k4 = jax.random.split(key, 4)
        # f32 master copies (used by the pure-JAX reference).
        self.qkv_w = xavier_uniform(k1, (3 * embed_dim, input_dim))  # torch (out, in)
        self.qkv_b = jnp.zeros((3 * embed_dim,), jnp.float32)
        self.o_w = xavier_uniform(k2, (embed_dim, embed_dim))
        self.o_b = jnp.zeros((embed_dim,), jnp.float32)
        if max_relative_position > 0:
            self.rel_k_table = xavier_uniform(
                k3, (2 * max_relative_position + 1, self.head_dim))
            # relative_position_v exists in the torch module, but forward() uses
            # relative_position_k for BOTH sk and sv — kept only for parity.
            self.rel_v_table = xavier_uniform(
                k4, (2 * max_relative_position + 1, self.head_dim))

        # bf16 kernel-side copies (halves weight DMA; MXU accumulates in f32).
        self._qkv_wt = self.qkv_w.T.astype(jnp.bfloat16)
        self._o_wt = self.o_w.T.astype(jnp.bfloat16)
        self._rel_k_bf16 = (self.rel_k_table.astype(jnp.bfloat16)
                            if max_relative_position > 0 else None)

    def __call__(self, x, mask=None, return_attention=False):
        B, S, _ = x.shape
        H, d, E = self.num_heads, self.head_dim, self.embed_dim
        R = self.max_relative_position

        # qkv projection; activations kept bf16 and lane-dense (B*S, 3E).
        qkv = pallas_linear(x.reshape(B * S, -1), self._qkv_wt, self.qkv_b,
                            out_dtype=jnp.bfloat16)
        qkv = qkv.reshape(B, S, 3 * E)   # free reshape; per-head q/k/v sliced in-kernel

        bucket = (relative_position_buckets(S, R, self.clip_pad) if R > 0 else None)

        mask_i8 = None
        if mask is not None:
            m = jnp.asarray(mask)
            if m.ndim == 4:
                # TODO(synk): true per-head masks would need an int8 (B,H,S,S) input
                # plus a per-head BlockSpec; the module is only used with head-shared
                # (padding / causal) masks, which is what we support here.
                m = m[:, 0]
            mask_i8 = jnp.broadcast_to(m, (B, S, S)).astype(jnp.int8)

        values, attention = pallas_attention(
            qkv, self._rel_k_bf16, bucket, mask_i8,
            H=H, d=d, R=R, want_attn=return_attention)

        # `values` is already in the lane-dense (B, S, embed_dim) layout.
        o = pallas_linear(values.reshape(B * S, E), self._o_wt, self.o_b,
                          out_dtype=jnp.float32).reshape(B, S, E)
        if return_attention:
            return o, attention
        return o


# ---------------------------------------------------------------------------
# Pure-JAX f32 reference (mirror of the PyTorch math) for verification
# ---------------------------------------------------------------------------

def reference_forward(m, x, mask=None):
    B, S, _ = x.shape
    qkv = x @ m.qkv_w.T + m.qkv_b
    qkv = qkv.reshape(B, S, m.num_heads, 3 * m.head_dim).transpose(0, 2, 1, 3)
    q, k, v = jnp.split(qkv, 3, axis=-1)
    logits = jnp.einsum('bhid,bhjd->bhij', q, k)
    if m.max_relative_position > 0:
        sk = relative_position_embeddings(
            m.rel_k_table, S, m.max_relative_position, m.clip_pad)
        logits = logits + jnp.einsum('bhid,ijd->bhij', q, sk)
    logits = logits / math.sqrt(m.head_dim)
    if mask is not None:
        logits = jnp.where(mask == 0, _MASK_FILL, logits)
    attn = jax.nn.softmax(logits, axis=-1)
    vals = jnp.einsum('bhij,bhjd->bhid', attn, v)
    if m.max_relative_position > 0:
        vals = vals + jnp.einsum('bhij,ijd->bhid', attn, sk)
    vals = vals.transpose(0, 2, 1, 3).reshape(B, S, m.embed_dim)
    return vals @ m.o_w.T + m.o_b, attn


if __name__ == "__main__":
    key = jax.random.PRNGKey(0)
    pkey, pkey2, xkey = jax.random.split(key, 3)

    B, S = 2, 8
    input_dim, embed_dim, num_heads = 32, 32, 4
    max_relative_position = 3

    mha = MultiheadAttentionPallas(
        pkey, input_dim, embed_dim, num_heads,
        max_relative_position=max_relative_position, clip_pad=True)
    x = jax.random.normal(xkey, (B, S, input_dim), jnp.float32)

    # Kernels use bf16 MXU operands; the reference is all-f32 -> moderate tolerance.
    tol = dict(atol=1e-1, rtol=1e-1)

    # 1) default path: no mask, no attention output (no mask DMA, no attn writeback)
    out = jax.block_until_ready(mha(x))
    ref, _ = reference_forward(mha, x)
    assert out.shape == (B, S, embed_dim)
    assert jnp.allclose(out, ref, **tol), "mismatch vs reference (no mask)"

    # 2) masked path with attention probabilities
    causal = (jnp.arange(S)[None, :] <= jnp.arange(S)[:, None]).astype(jnp.float32)
    out_m, attn_m = mha(x, mask=causal, return_attention=True)
    out_m = jax.block_until_ready(out_m)
    ref_m, ref_attn = reference_forward(mha, x, mask=causal)
    assert out_m.shape == (B, S, embed_dim)
    assert attn_m.shape == (B, num_heads, S, S)
    assert jnp.allclose(out_m, ref_m, **tol), "mismatch vs reference (masked)"
    assert jnp.allclose(attn_m, ref_attn, **tol), "attention mismatch vs reference"

    # 3) no relative-position path (max_relative_position == 0)
    mha0 = MultiheadAttentionPallas(pkey2, input_dim, embed_dim, num_heads,
                                    max_relative_position=0)
    out0 = jax.block_until_ready(mha0(x))
    ref0, _ = reference_forward(mha0, x)
    assert jnp.allclose(out0, ref0, **tol), "mismatch vs reference (no rel-pos)"

    print("KERNEL_OK")
</pallas_src>

<mosaic_0001>
module attributes {stable_mosaic.version = 11 : i64} {
  func.func @_linear_kernel(%arg0: i32, %arg1: memref<16x32xf32, #tpu.memory_space<vmem>>, %arg2: memref<32x96xbf16, #tpu.memory_space<vmem>>, %arg3: memref<1x96xf32, #tpu.memory_space<vmem>>, %arg4: memref<16x96xbf16, #tpu.memory_space<vmem>>) attributes {dimension_semantics = [#tpu.dimension_semantics<parallel>], iteration_bounds = array<i64: 1>, scalar_prefetch = 0 : i64, scratch_operands = 0 : i64, tpu.core_type = #tpu.core_type<tc>, window_params = [{transform_indices = @transform_0, window_bounds = array<i64: 16, 32>}, {pipeline_mode = #tpu.pipeline_mode<synchronous>, transform_indices = @transform_1, window_bounds = array<i64: 32, 96>}, {pipeline_mode = #tpu.pipeline_mode<synchronous>, transform_indices = @transform_2, window_bounds = array<i64: 1, 96>}, {transform_indices = @transform_3, window_bounds = array<i64: 16, 96>}]} {
    %c0 = arith.constant 0 : index
    %c0_0 = arith.constant 0 : index
    %0 = vector.load %arg1[%c0, %c0_0] : memref<16x32xf32, #tpu.memory_space<vmem>>, vector<16x32xf32>
    %1 = arith.truncf %0 : vector<16x32xf32> to vector<16x32xbf16>
    %c0_1 = arith.constant 0 : index
    %c0_2 = arith.constant 0 : index
    %2 = vector.load %arg2[%c0_1, %c0_2] : memref<32x96xbf16, #tpu.memory_space<vmem>>, vector<32x96xbf16>
    %cst = arith.constant dense<0.000000e+00> : vector<16x96xf32>
    %3 = tpu.matmul %1, %2, %cst {dimension_numbers = #tpu.dot_dimension_numbers<[1], [0], [0], [1], [0, 0, 1, 1], [], []>} : vector<16x32xbf16>, vector<32x96xbf16>, vector<16x96xf32> -> vector<16x96xf32>
    %c0_3 = arith.constant 0 : index
    %c0_4 = arith.constant 0 : index
    %4 = vector.load %arg3[%c0_3, %c0_4] : memref<1x96xf32, #tpu.memory_space<vmem>>, vector<1x96xf32>
    %5 = vector.broadcast %4 : vector<1x96xf32> to vector<16x96xf32>
    %6 = arith.addf %3, %5 : vector<16x96xf32>
    %7 = arith.truncf %6 : vector<16x96xf32> to vector<16x96xbf16>
    %c0_5 = arith.constant 0 : index
    %c0_6 = arith.constant 0 : index
    %8 = vector.load %arg4[%c0_5, %c0_6] : memref<16x96xbf16, #tpu.memory_space<vmem>>, vector<16x96xbf16>
    tpu.vector_store %arg4[%c0_5, %c0_6], %7 {strides = array<i32>} : memref<16x96xbf16, #tpu.memory_space<vmem>>, vector<16x96xbf16>,
    return
  }
  func.func @transform_0(%arg0: i32) -> (i32, i32) {
    %c0_i32 = arith.constant 0 : i32
    %c0_i32_0 = arith.constant 0 : i32
    return %arg0, %c0_i32 : i32, i32
  }
  func.func @transform_1(%arg0: i32) -> (i32, i32) {
    %c0_i32 = arith.constant 0 : i32
    %c0_i32_0 = arith.constant 0 : i32
    %c0_i32_1 = arith.constant 0 : i32
    return %c0_i32, %c0_i32_0 : i32, i32
  }
  func.func @transform_2(%arg0: i32) -> (i32, i32) {
    %c0_i32 = arith.constant 0 : i32
    %c0_i32_0 = arith.constant 0 : i32
    %c0_i32_1 = arith.constant 0 : i32
    return %c0_i32, %c0_i32_0 : i32, i32
  }
  func.func @transform_3(%arg0: i32) -> (i32, i32) {
    %c0_i32 = arith.constant 0 : i32
    %c0_i32_0 = arith.constant 0 : i32
    return %arg0, %c0_i32 : i32, i32
  }
}

</mosaic_0001>

<bundles_post_ra>
// kernel: tpu_custom_call.1
= control target key start
LH: loop header
LB: loop body
LE: loop exit
PB: predicated region body
PF: predicated region fallthrough
CT: control target
= control target key end

     0   :  { %8 = vsyncpa [#allocation3], 0  ;;  %s256_s0 = inlined_call_operand.hbm [shape: f32[16,32], index: 0, kind: input, shape index: {}]   ;;  %s257_s1 = inlined_call_operand.hbm [shape: bf16[32,96], index: 1, kind: input, shape index: {}]   ;;  %s258_s2 = inlined_call_operand.vmem [shape: f32[1,96], index: 2, kind: input, shape index: {}]   ;;  %s259_s3 = inlined_call_operand.hbm [shape: bf16[16,96], index: 3, kind: output, shape index: {}]  }
   0x1   :  { %9 = vsyncpa [#allocation6], 0 }
   0x2   :  { %10 = vsyncpa [#allocation4], 0  ;;  %s15_s14 = sshll.u32 %s256_s0, 4  ;;  %s211_s15 = smov [#allocation2]   ;;  %s16_s14 = int_to_ptr.hbm [resolvable:$true] %s15_s14 }
   0x3   :  { %s17_s16 = sshll.u32 %s211_s15, 4  ;;  %s28_s19 = sshll.u32 %s257_s1, 4  ;;  %s18_s16 = int_to_ptr.vmem [resolvable:$true] %s17_s16  ;;  %s29_s19 = int_to_ptr.hbm [resolvable:$true] %s28_s19 }
   0x4   :  { %s212_s20 = smov 128   ;;  %s213_s21 = smov 8  }
   0x5   :  { %23 = dma.hbm_to_vmem [thread:$0]  %s16_s14, 256, %s18_s16, [#allocation3], %s212_s20, %s212_s20, %s213_s21  }
   0x6   :  { %s214_s22 = smov [#allocation5]   ;;  %s215_s24 = smov 64  }
   0x7   :  { %s30_s23 = sshll.u32 %s214_s22, 4  ;;  %s216_s25 = smov 4   ;;  %s31_s23 = int_to_ptr.vmem [resolvable:$true] %s30_s23 }
   0x8   :  { %36 = dma.hbm_to_vmem [thread:$0]  %s29_s19, 256, %s31_s23, [#allocation6], %s215_s24, %s215_s24, %s216_s25  }
   0x9   :  { %205 = dma.done.wait [#allocation3], 256  }
   0xa   :  { %206 = vsyncadd [#allocation3], 4294967040 }
   0xb   :  { %207 = dma.done.wait [#allocation6], 256  }
   0xc   :  { %208 = vsyncadd [#allocation6], 4294967040  ;;  %v124_v0 = vld [vmem:[#allocation5 + $0x8] sm:$0xff]  ;;  %v123_v1 = vld [vmem:[#allocation5] sm:$0xff]  ;;  %vm71_vm0 = vcmask 261120   ;;  %vm91_vm1 = vcmask 781312  }
   0xd   :  { %81 = vmatpush.bf16.msra.mxu0 %v124_v0  ;;  %v48_v2 = vld [vmem:[#allocation2] sm:$0xff]  ;;  %v49_v3 = vld [vmem:[#allocation2 + $0x8] sm:$0xff]  ;;  %s217_s26 = smov [#allocation7]   ;;  %s100_s30 = sshll.u32 %s259_s3, 4  ;;  %s101_s30 = int_to_ptr.hbm [resolvable:$true] %s100_s30 }
   0xe   :  { %v50_v4 = vpack.c.bf16 %v49_v3, %v48_v2  ;;  %v132_v5 = vld [vmem:[%s258_s2] ss:$0 sm:$0xff]  ;;  %s98_s27 = sshll.u32 %s217_s26, 4  ;;  %s99_s27 = int_to_ptr.vmem [resolvable:$true] %s98_s27 }
  0x11   :  { %82 = vmatpush.bf16.msra.mxu0 %v123_v1 }
  0x14   :  { %122 = vmatmul.msk.bf16.vlgmr.msra.gmra.mxu0 %vm71_vm0, %v50_v4 }
  0x91   :  { %v84_v6 = vpop.f32.mrf.mxu0 }
  0x92   :  { %v85_v7 = vadd.f32 %v132_v5, %v84_v6 }
  0x94   :  { %v89_v8 = vpack.c.bf16 %v85_v7, %v85_v7 }
  0x96   :  { %92 = vst.msk [vmem:[#allocation7] sm:$0xf] %vm91_vm1, %v89_v8 }
  0x99   :  { %v86_v9 = vpop.f32.mrf.mxu0 }
  0x9a   :  { %v87_v10 = vadd.f32 %v132_v5, %v86_v9 }
  0x9c   :  { %v90_v11 = vpack.c.bf16 %v87_v10, %v87_v10 }
  0x9e   :  { %93 = vst.msk [vmem:[#allocation7 + $0x4] sm:$0xf] %vm91_vm1, %v90_v11 }
  0x9f   :  { %106 = dma.vmem_to_hbm [thread:$0]  %s99_s27, 128, %s101_s30, [#allocation4], %s215_s24, %s215_s24, %s216_s25  }
  0xa0   :  { %209 = dma.done.wait [#allocation4], 128  }
  0xa1   :  { %210 = vsyncadd [#allocation4], 4294967168 }
  0xa2   :  { %111 = vsyncpa [#allocation3], 1 }
  0xa3   :  { %112 = vsyncpa [#allocation6], 1 }
  0xa4   :  { %113 = vsyncpa [#allocation4], 1 }

</bundles_post_ra>
